<compile_context>
chip_gen: v7x
topology: tpu7x:2x2x1
jax: 0.10.0
libtpu: 0.0.40
codegen_flags: <defaults>
</compile_context>

<pallas_src>
import functools

import jax
import jax.numpy as jnp
from jax.experimental import pallas as pl
from jax.experimental.pallas import tpu as pltpu

NEG_SLOPE = 0.01  # PyTorch F.leaky_relu default


def _leaky(v):
    return jnp.where(v > 0, v, NEG_SLOPE * v)


def _round_up(x, m):
    return ((x + m - 1) // m) * m


def _make_cum_return_kernel(t_actual, tm, matmul_dtype):
    """Kernel closure: runs the 4-layer MLP on a (tm, 256) tile of one
    trajectory and accumulates sum(r) / sum(|r|) over its time axis."""
    needs_mask = (t_actual % tm) != 0

    def kernel(x_ref, w1_ref, b1_ref, w2_ref, b2_ref, w3_ref, b3_ref,
               w4_ref, b4_ref, out_ref, acc_sum_ref, acc_abs_ref):
        t = pl.program_id(1)

        @pl.when(t == 0)
        def _():
            acc_sum_ref[...] = jnp.zeros_like(acc_sum_ref)
            acc_abs_ref[...] = jnp.zeros_like(acc_abs_ref)

        x = x_ref[...].astype(matmul_dtype)                              # (tm, 256)
        h = _leaky(jnp.dot(x, w1_ref[...],
                           preferred_element_type=jnp.float32) + b1_ref[...])  # (tm, 128)
        h = _leaky(jnp.dot(h.astype(matmul_dtype), w2_ref[...],
                           preferred_element_type=jnp.float32) + b2_ref[...])  # (tm, 128)
        h = _leaky(jnp.dot(h.astype(matmul_dtype), w3_ref[...],
                           preferred_element_type=jnp.float32) + b3_ref[...])  # (tm, 128), lanes 64.. are 0
        r = _leaky(jnp.dot(h.astype(matmul_dtype), w4_ref[...],
                           preferred_element_type=jnp.float32) + b4_ref[...])  # (tm, 128), only lane 0 real

        if needs_mask:
            row = jax.lax.broadcasted_iota(jnp.int32, (tm, 1), 0) + t * tm
            r = jnp.where(row < t_actual, r, 0.0)   # mask padded trailing rows

        acc_sum_ref[...] += jnp.sum(r, axis=0, keepdims=True)            # (1, 128)
        acc_abs_ref[...] += jnp.sum(jnp.abs(r), axis=0, keepdims=True)   # (1, 128)

        @pl.when(t == pl.num_programs(1) - 1)
        def _():
            out_ref[...] = jnp.concatenate(
                [acc_sum_ref[...], acc_abs_ref[...]], axis=0)            # (2, 128)

    return kernel


def cum_returns_pallas(traj_pair, params, *, matmul_dtype=jnp.float32, tm=None):
    """traj_pair: (2, T, 256).  Returns (2, 2, 128):
       out[b, 0, 0] = sum(r_b), out[b, 1, 0] = sum(|r_b|)."""
    w1, b1, w2, b2, w3, b3, w4, b4 = params
    B, T, D = traj_pair.shape
    assert B == 2 and D == 256

    if tm is None:
        tm = 512 if T >= 512 else _round_up(T, 8)
    else:
        tm = _round_up(min(tm, _round_up(T, 8)), 8)
    t_pad = _round_up(T, tm)
    if t_pad != T:
        traj_pair = jnp.pad(traj_pair, ((0, 0), (0, t_pad - T), (0, 0)))

    # Pad fc3 output and fc4 to 128 lanes (leaky_relu(0) == 0 keeps padded
    # lanes exactly zero, so reductions are unchanged).
    w3p = jnp.zeros((128, 128), jnp.float32).at[:, :64].set(w3)
    b3p = jnp.zeros((1, 128), jnp.float32).at[:, :64].set(b3.reshape(1, 64))
    w4p = jnp.zeros((128, 128), jnp.float32).at[:64, 0:1].set(w4)
    b4p = jnp.zeros((1, 128), jnp.float32).at[:, 0:1].set(b4.reshape(1, 1))

    mm = matmul_dtype
    weight_args = (w1.astype(mm), b1.reshape(1, 128),
                   w2.astype(mm), b2.reshape(1, 128),
                   w3p.astype(mm), b3p,
                   w4p.astype(mm), b4p)

    wspec = lambda shape: pl.BlockSpec(shape, lambda b, t: (0, 0))

    out = pl.pallas_call(
        _make_cum_return_kernel(T, tm, mm),
        out_shape=jax.ShapeDtypeStruct((2, 2, 128), jnp.float32),
        grid_spec=pltpu.PrefetchScalarGridSpec(
            num_scalar_prefetch=0,
            grid=(2, t_pad // tm),                       # (trajectory, time tiles)
            in_specs=[
                pl.BlockSpec((None, tm, 256), lambda b, t: (b, t, 0)),  # traj tile
                wspec((256, 128)), wspec((1, 128)),      # fc1
                wspec((128, 128)), wspec((1, 128)),      # fc2
                wspec((128, 128)), wspec((1, 128)),      # fc3 (padded)
                wspec((128, 128)), wspec((1, 128)),      # fc4 (padded)
            ],
            out_specs=pl.BlockSpec((None, 2, 128), lambda b, t: (b, 0, 0)),
            scratch_shapes=[pltpu.VMEM((1, 128), jnp.float32),
                            pltpu.VMEM((1, 128), jnp.float32)],
        ),
        compiler_params=pltpu.CompilerParams(
            dimension_semantics=("parallel", "arbitrary")),
    )(traj_pair.astype(jnp.float32), *weight_args)

    return out


@functools.partial(jax.jit, static_argnames=("matmul_dtype",))
def reward_net_forward(traj_i, traj_j, params, matmul_dtype=jnp.float32):
    """Equivalent of RewardNetPointCloud.forward."""
    traj_pair = jnp.stack([traj_i, traj_j], axis=0)          # (2, T, 256)
    out = cum_returns_pallas(traj_pair, params, matmul_dtype=matmul_dtype)
    logits = out[:, 0, 0]                                    # (cum_i, cum_j)
    abs_total = out[0, 1, 0] + out[1, 1, 0]
    return logits, abs_total


def init_params(key):
    """Deterministic synthetic weights, PyTorch Linear conventions stored
    as (in_features, out_features)."""
    ks = jax.random.split(key, 8)
    def lin(kw, kb, fan_in, fan_out):
        bound = 1.0 / jnp.sqrt(fan_in)
        w = jax.random.uniform(kw, (fan_in, fan_out), jnp.float32, -bound, bound)
        b = jax.random.uniform(kb, (fan_out,), jnp.float32, -bound, bound)
        return w, b
    w1, b1 = lin(ks[0], ks[1], 256, 128)
    w2, b2 = lin(ks[2], ks[3], 128, 128)
    w3, b3 = lin(ks[4], ks[5], 128, 64)
    w4, b4 = lin(ks[6], ks[7], 64, 1)
    return (w1, b1, w2, b2, w3, b3, w4, b4)


def _reference_forward(traj_i, traj_j, params, matmul_dtype=jnp.float32):
    """Pure-JAX reference (matches kernel's mixed-precision recipe)."""
    w1, b1, w2, b2, w3, b3, w4, b4 = params
    def lin(x, w, b):
        return jnp.dot(x.astype(matmul_dtype), w.astype(matmul_dtype),
                       preferred_element_type=jnp.float32) + b
    def cum(x):
        h = _leaky(lin(x, w1, b1))
        h = _leaky(lin(h, w2, b2))
        h = _leaky(lin(h, w3, b3))
        r = _leaky(lin(h, w4, b4))
        return jnp.sum(r), jnp.sum(jnp.abs(r))
    ci, ai = cum(traj_i)
    cj, aj = cum(traj_j)
    return jnp.stack([ci, cj]), ai + aj


if __name__ == "__main__":
    key = jax.random.PRNGKey(0)
    k_params, k_i, k_j = jax.random.split(key, 3)
    params = init_params(k_params)

    # Small test: T = 8 trajectory of 256-d point-cloud embeddings, f32.
    T = 8
    traj_i = jax.random.normal(k_i, (T, 256), jnp.float32)
    traj_j = jax.random.normal(k_j, (T, 256), jnp.float32)

    logits, abs_sum = reward_net_forward(traj_i, traj_j, params)
    jax.block_until_ready((logits, abs_sum))

    ref_logits, ref_abs = _reference_forward(traj_i, traj_j, params)
    assert jnp.allclose(logits, ref_logits, rtol=1e-4, atol=1e-4)
    assert jnp.allclose(abs_sum, ref_abs, rtol=1e-4, atol=1e-4)

    # Second test: non-divisible T (exercises remainder masking) with the
    # bf16 matmul path (v6e/v7x MXU throughput), f32 accumulation.
    T2 = 300
    ti2 = jax.random.normal(jax.random.PRNGKey(1), (T2, 256), jnp.float32)
    tj2 = jax.random.normal(jax.random.PRNGKey(2), (T2, 256), jnp.float32)
    logits2, abs2 = reward_net_forward(ti2, tj2, params,
                                       matmul_dtype=jnp.bfloat16)
    jax.block_until_ready((logits2, abs2))
    ref_l2, ref_a2 = _reference_forward(ti2, tj2, params,
                                        matmul_dtype=jnp.bfloat16)
    assert jnp.allclose(logits2, ref_l2, rtol=1e-3, atol=1e-2)
    assert jnp.allclose(abs2, ref_a2, rtol=1e-3, atol=1e-2)

    print("KERNEL_OK")
</pallas_src>

<mosaic_0001>
module attributes {stable_mosaic.version = 11 : i64} {
  func.func @kernel(%arg0: i32, %arg1: i32, %arg2: memref<1x8x256xf32, #tpu.memory_space<vmem>>, %arg3: memref<256x128xf32, #tpu.memory_space<vmem>>, %arg4: memref<1x128xf32, #tpu.memory_space<vmem>>, %arg5: memref<128x128xf32, #tpu.memory_space<vmem>>, %arg6: memref<1x128xf32, #tpu.memory_space<vmem>>, %arg7: memref<128x128xf32, #tpu.memory_space<vmem>>, %arg8: memref<1x128xf32, #tpu.memory_space<vmem>>, %arg9: memref<128x128xf32, #tpu.memory_space<vmem>>, %arg10: memref<1x128xf32, #tpu.memory_space<vmem>>, %arg11: memref<1x2x128xf32, #tpu.memory_space<vmem>>, %arg12: memref<1x128xf32, #tpu.memory_space<vmem>>, %arg13: memref<1x128xf32, #tpu.memory_space<vmem>>) attributes {dimension_semantics = [#tpu.dimension_semantics<parallel>, #tpu.dimension_semantics<arbitrary>], iteration_bounds = array<i64: 2, 1>, scalar_prefetch = 0 : i64, scratch_operands = 2 : i64, tpu.core_type = #tpu.core_type<tc>, window_params = [{transform_indices = @transform_0, window_bounds = array<i64: 1, 8, 256>}, {pipeline_mode = #tpu.pipeline_mode<synchronous>, transform_indices = @transform_1, window_bounds = array<i64: 256, 128>}, {pipeline_mode = #tpu.pipeline_mode<synchronous>, transform_indices = @transform_2, window_bounds = array<i64: 1, 128>}, {pipeline_mode = #tpu.pipeline_mode<synchronous>, transform_indices = @transform_3, window_bounds = array<i64: 128, 128>}, {pipeline_mode = #tpu.pipeline_mode<synchronous>, transform_indices = @transform_4, window_bounds = array<i64: 1, 128>}, {pipeline_mode = #tpu.pipeline_mode<synchronous>, transform_indices = @transform_5, window_bounds = array<i64: 128, 128>}, {pipeline_mode = #tpu.pipeline_mode<synchronous>, transform_indices = @transform_6, window_bounds = array<i64: 1, 128>}, {pipeline_mode = #tpu.pipeline_mode<synchronous>, transform_indices = @transform_7, window_bounds = array<i64: 128, 128>}, {pipeline_mode = #tpu.pipeline_mode<synchronous>, transform_indices = @transform_8, window_bounds = array<i64: 1, 128>}, {transform_indices = @transform_9, window_bounds = array<i64: 1, 2, 128>}]} {
    %c0_i32 = arith.constant 0 : i32
    %0 = arith.cmpi eq, %arg1, %c0_i32 : i32
    %1 = arith.extui %0 : i1 to i32
    %c0_i32_0 = arith.constant 0 : i32
    %2 = arith.cmpi ne, %1, %c0_i32_0 : i32
    scf.if %2 {
      %cst_42 = arith.constant 0.000000e+00 : f32
      %59 = vector.broadcast %cst_42 : f32 to vector<1x128xf32>
      %c0_43 = arith.constant 0 : index
      %c0_44 = arith.constant 0 : index
      %60 = vector.load %arg12[%c0_43, %c0_44] : memref<1x128xf32, #tpu.memory_space<vmem>>, vector<1x128xf32>
      tpu.vector_store %arg12[%c0_43, %c0_44], %59 {strides = array<i32>} : memref<1x128xf32, #tpu.memory_space<vmem>>, vector<1x128xf32>,
      %cst_45 = arith.constant 0.000000e+00 : f32
      %61 = vector.broadcast %cst_45 : f32 to vector<1x128xf32>
      %c0_46 = arith.constant 0 : index
      %c0_47 = arith.constant 0 : index
      %62 = vector.load %arg13[%c0_46, %c0_47] : memref<1x128xf32, #tpu.memory_space<vmem>>, vector<1x128xf32>
      tpu.vector_store %arg13[%c0_46, %c0_47], %61 {strides = array<i32>} : memref<1x128xf32, #tpu.memory_space<vmem>>, vector<1x128xf32>,
    } else {
    }
    %c0 = arith.constant 0 : index
    %c0_1 = arith.constant 0 : index
    %c0_2 = arith.constant 0 : index
    %3 = vector.load %arg2[%c0, %c0_1, %c0_2] : memref<1x8x256xf32, #tpu.memory_space<vmem>>, vector<1x8x256xf32>
    %4 = vector.shape_cast %3 : vector<1x8x256xf32> to vector<8x256xf32>
    %c0_3 = arith.constant 0 : index
    %c0_4 = arith.constant 0 : index
    %5 = vector.load %arg3[%c0_3, %c0_4] : memref<256x128xf32, #tpu.memory_space<vmem>>, vector<256x128xf32>
    %cst = arith.constant dense<0.000000e+00> : vector<8x128xf32>
    %6 = tpu.matmul %4, %5, %cst {dimension_numbers = #tpu.dot_dimension_numbers<[1], [0], [0], [1], [0, 0, 1, 1], [], []>} : vector<8x256xf32>, vector<256x128xf32>, vector<8x128xf32> -> vector<8x128xf32>
    %c0_5 = arith.constant 0 : index
    %c0_6 = arith.constant 0 : index
    %7 = vector.load %arg4[%c0_5, %c0_6] : memref<1x128xf32, #tpu.memory_space<vmem>>, vector<1x128xf32>
    %8 = vector.broadcast %7 : vector<1x128xf32> to vector<8x128xf32>
    %9 = arith.addf %6, %8 : vector<8x128xf32>
    %cst_7 = arith.constant 0.000000e+00 : f32
    %10 = vector.broadcast %cst_7 : f32 to vector<8x128xf32>
    %11 = arith.cmpf ogt, %9, %10 : vector<8x128xf32>
    %cst_8 = arith.constant 0.00999999977 : f32
    %12 = vector.broadcast %cst_8 : f32 to vector<8x128xf32>
    %13 = arith.mulf %12, %9 : vector<8x128xf32>
    %14 = arith.select %11, %9, %13 : vector<8x128xi1>, vector<8x128xf32>
    %c0_9 = arith.constant 0 : index
    %c0_10 = arith.constant 0 : index
    %15 = vector.load %arg5[%c0_9, %c0_10] : memref<128x128xf32, #tpu.memory_space<vmem>>, vector<128x128xf32>
    %cst_11 = arith.constant dense<0.000000e+00> : vector<8x128xf32>
    %16 = tpu.matmul %14, %15, %cst_11 {dimension_numbers = #tpu.dot_dimension_numbers<[1], [0], [0], [1], [0, 0, 1, 1], [], []>} : vector<8x128xf32>, vector<128x128xf32>, vector<8x128xf32> -> vector<8x128xf32>
    %c0_12 = arith.constant 0 : index
    %c0_13 = arith.constant 0 : index
    %17 = vector.load %arg6[%c0_12, %c0_13] : memref<1x128xf32, #tpu.memory_space<vmem>>, vector<1x128xf32>
    %18 = vector.broadcast %17 : vector<1x128xf32> to vector<8x128xf32>
    %19 = arith.addf %16, %18 : vector<8x128xf32>
    %cst_14 = arith.constant 0.000000e+00 : f32
    %20 = vector.broadcast %cst_14 : f32 to vector<8x128xf32>
    %21 = arith.cmpf ogt, %19, %20 : vector<8x128xf32>
    %cst_15 = arith.constant 0.00999999977 : f32
    %22 = vector.broadcast %cst_15 : f32 to vector<8x128xf32>
    %23 = arith.mulf %22, %19 : vector<8x128xf32>
    %24 = arith.select %21, %19, %23 : vector<8x128xi1>, vector<8x128xf32>
    %c0_16 = arith.constant 0 : index
    %c0_17 = arith.constant 0 : index
    %25 = vector.load %arg7[%c0_16, %c0_17] : memref<128x128xf32, #tpu.memory_space<vmem>>, vector<128x128xf32>
    %cst_18 = arith.constant dense<0.000000e+00> : vector<8x128xf32>
    %26 = tpu.matmul %24, %25, %cst_18 {dimension_numbers = #tpu.dot_dimension_numbers<[1], [0], [0], [1], [0, 0, 1, 1], [], []>} : vector<8x128xf32>, vector<128x128xf32>, vector<8x128xf32> -> vector<8x128xf32>
    %c0_19 = arith.constant 0 : index
    %c0_20 = arith.constant 0 : index
    %27 = vector.load %arg8[%c0_19, %c0_20] : memref<1x128xf32, #tpu.memory_space<vmem>>, vector<1x128xf32>
    %28 = vector.broadcast %27 : vector<1x128xf32> to vector<8x128xf32>
    %29 = arith.addf %26, %28 : vector<8x128xf32>
    %cst_21 = arith.constant 0.000000e+00 : f32
    %30 = vector.broadcast %cst_21 : f32 to vector<8x128xf32>
    %31 = arith.cmpf ogt, %29, %30 : vector<8x128xf32>
    %cst_22 = arith.constant 0.00999999977 : f32
    %32 = vector.broadcast %cst_22 : f32 to vector<8x128xf32>
    %33 = arith.mulf %32, %29 : vector<8x128xf32>
    %34 = arith.select %31, %29, %33 : vector<8x128xi1>, vector<8x128xf32>
    %c0_23 = arith.constant 0 : index
    %c0_24 = arith.constant 0 : index
    %35 = vector.load %arg9[%c0_23, %c0_24] : memref<128x128xf32, #tpu.memory_space<vmem>>, vector<128x128xf32>
    %cst_25 = arith.constant dense<0.000000e+00> : vector<8x128xf32>
    %36 = tpu.matmul %34, %35, %cst_25 {dimension_numbers = #tpu.dot_dimension_numbers<[1], [0], [0], [1], [0, 0, 1, 1], [], []>} : vector<8x128xf32>, vector<128x128xf32>, vector<8x128xf32> -> vector<8x128xf32>
    %c0_26 = arith.constant 0 : index
    %c0_27 = arith.constant 0 : index
    %37 = vector.load %arg10[%c0_26, %c0_27] : memref<1x128xf32, #tpu.memory_space<vmem>>, vector<1x128xf32>
    %38 = vector.broadcast %37 : vector<1x128xf32> to vector<8x128xf32>
    %39 = arith.addf %36, %38 : vector<8x128xf32>
    %cst_28 = arith.constant 0.000000e+00 : f32
    %40 = vector.broadcast %cst_28 : f32 to vector<8x128xf32>
    %41 = arith.cmpf ogt, %39, %40 : vector<8x128xf32>
    %cst_29 = arith.constant 0.00999999977 : f32
    %42 = vector.broadcast %cst_29 : f32 to vector<8x128xf32>
    %43 = arith.mulf %42, %39 : vector<8x128xf32>
    %44 = arith.select %41, %39, %43 : vector<8x128xi1>, vector<8x128xf32>
    %c0_30 = arith.constant 0 : index
    %c0_31 = arith.constant 0 : index
    %45 = vector.load %arg12[%c0_30, %c0_31] : memref<1x128xf32, #tpu.memory_space<vmem>>, vector<1x128xf32>
    %cst_32 = arith.constant dense<0.000000e+00> : vector<128xf32>
    %46 = vector.multi_reduction <add>, %44, %cst_32 [0] : vector<8x128xf32> to vector<128xf32>
    %47 = vector.shape_cast %46 : vector<128xf32> to vector<1x128xf32>
    %48 = arith.addf %45, %47 : vector<1x128xf32>
    %c0_33 = arith.constant 0 : index
    %c0_34 = arith.constant 0 : index
    %49 = vector.load %arg12[%c0_33, %c0_34] : memref<1x128xf32, #tpu.memory_space<vmem>>, vector<1x128xf32>
    tpu.vector_store %arg12[%c0_33, %c0_34], %48 {strides = array<i32>} : memref<1x128xf32, #tpu.memory_space<vmem>>, vector<1x128xf32>,
    %c0_35 = arith.constant 0 : index
    %c0_36 = arith.constant 0 : index
    %50 = vector.load %arg13[%c0_35, %c0_36] : memref<1x128xf32, #tpu.memory_space<vmem>>, vector<1x128xf32>
    %51 = math.absf %44 : vector<8x128xf32>
    %cst_37 = arith.constant dense<0.000000e+00> : vector<128xf32>
    %52 = vector.multi_reduction <add>, %51, %cst_37 [0] : vector<8x128xf32> to vector<128xf32>
    %53 = vector.shape_cast %52 : vector<128xf32> to vector<1x128xf32>
    %54 = arith.addf %50, %53 : vector<1x128xf32>
    %c0_38 = arith.constant 0 : index
    %c0_39 = arith.constant 0 : index
    %55 = vector.load %arg13[%c0_38, %c0_39] : memref<1x128xf32, #tpu.memory_space<vmem>>, vector<1x128xf32>
    tpu.vector_store %arg13[%c0_38, %c0_39], %54 {strides = array<i32>} : memref<1x128xf32, #tpu.memory_space<vmem>>, vector<1x128xf32>,
    %c0_i32_40 = arith.constant 0 : i32
    %56 = arith.cmpi eq, %arg1, %c0_i32_40 : i32
    %57 = arith.extui %56 : i1 to i32
    %c0_i32_41 = arith.constant 0 : i32
    %58 = arith.cmpi ne, %57, %c0_i32_41 : i32
    scf.if %58 {
      %c0_42 = arith.constant 0 : index
      %c0_43 = arith.constant 0 : index
      %59 = vector.load %arg12[%c0_42, %c0_43] : memref<1x128xf32, #tpu.memory_space<vmem>>, vector<1x128xf32>
      %c0_44 = arith.constant 0 : index
      %c0_45 = arith.constant 0 : index
      %60 = vector.load %arg13[%c0_44, %c0_45] : memref<1x128xf32, #tpu.memory_space<vmem>>, vector<1x128xf32>
      %61 = tpu.concatenate %59, %60 in 0 : vector<1x128xf32>, vector<1x128xf32> -> vector<2x128xf32>
      %c0_46 = arith.constant 0 : index
      %c0_47 = arith.constant 0 : index
      %c0_48 = arith.constant 0 : index
      %62 = vector.load %arg11[%c0_46, %c0_47, %c0_48] : memref<1x2x128xf32, #tpu.memory_space<vmem>>, vector<1x2x128xf32>
      %63 = vector.shape_cast %62 : vector<1x2x128xf32> to vector<2x128xf32>
      %64 = vector.shape_cast %61 : vector<2x128xf32> to vector<1x2x128xf32>
      tpu.vector_store %arg11[%c0_46, %c0_47, %c0_48], %64 {strides = array<i32>} : memref<1x2x128xf32, #tpu.memory_space<vmem>>, vector<1x2x128xf32>,
    } else {
    }
    return
  }
  func.func @transform_0(%arg0: i32, %arg1: i32) -> (i32, i32, i32) {
    %c0_i32 = arith.constant 0 : i32
    %c0_i32_0 = arith.constant 0 : i32
    return %arg0, %arg1, %c0_i32 : i32, i32, i32
  }
  func.func @transform_1(%arg0: i32, %arg1: i32) -> (i32, i32) {
    %c0_i32 = arith.constant 0 : i32
    %c0_i32_0 = arith.constant 0 : i32
    %c0_i32_1 = arith.constant 0 : i32
    return %c0_i32, %c0_i32_0 : i32, i32
  }
  func.func @transform_2(%arg0: i32, %arg1: i32) -> (i32, i32) {
    %c0_i32 = arith.constant 0 : i32
    %c0_i32_0 = arith.constant 0 : i32
    %c0_i32_1 = arith.constant 0 : i32
    return %c0_i32, %c0_i32_0 : i32, i32
  }
  func.func @transform_3(%arg0: i32, %arg1: i32) -> (i32, i32) {
    %c0_i32 = arith.constant 0 : i32
    %c0_i32_0 = arith.constant 0 : i32
    %c0_i32_1 = arith.constant 0 : i32
    return %c0_i32, %c0_i32_0 : i32, i32
  }
  func.func @transform_4(%arg0: i32, %arg1: i32) -> (i32, i32) {
    %c0_i32 = arith.constant 0 : i32
    %c0_i32_0 = arith.constant 0 : i32
    %c0_i32_1 = arith.constant 0 : i32
    return %c0_i32, %c0_i32_0 : i32, i32
  }
  func.func @transform_5(%arg0: i32, %arg1: i32) -> (i32, i32) {
    %c0_i32 = arith.constant 0 : i32
    %c0_i32_0 = arith.constant 0 : i32
    %c0_i32_1 = arith.constant 0 : i32
    return %c0_i32, %c0_i32_0 : i32, i32
  }
  func.func @transform_6(%arg0: i32, %arg1: i32) -> (i32, i32) {
    %c0_i32 = arith.constant 0 : i32
    %c0_i32_0 = arith.constant 0 : i32
    %c0_i32_1 = arith.constant 0 : i32
    return %c0_i32, %c0_i32_0 : i32, i32
  }
  func.func @transform_7(%arg0: i32, %arg1: i32) -> (i32, i32) {
    %c0_i32 = arith.constant 0 : i32
    %c0_i32_0 = arith.constant 0 : i32
    %c0_i32_1 = arith.constant 0 : i32
    return %c0_i32, %c0_i32_0 : i32, i32
  }
  func.func @transform_8(%arg0: i32, %arg1: i32) -> (i32, i32) {
    %c0_i32 = arith.constant 0 : i32
    %c0_i32_0 = arith.constant 0 : i32
    %c0_i32_1 = arith.constant 0 : i32
    return %c0_i32, %c0_i32_0 : i32, i32
  }
  func.func @transform_9(%arg0: i32, %arg1: i32) -> (i32, i32, i32) {
    %c0_i32 = arith.constant 0 : i32
    %c0_i32_0 = arith.constant 0 : i32
    %c0_i32_1 = arith.constant 0 : i32
    return %arg0, %c0_i32, %c0_i32_0 : i32, i32, i32
  }
}

</mosaic_0001>

<bundles_post_ra>
// kernel: reward_net_forward.1
= control target key start
LH: loop header
LB: loop body
LE: loop exit
PB: predicated region body
PF: predicated region fallthrough
CT: control target
= control target key end

     0   :  { %s1283_s30 = smov 0   ;;  %s1285_s10 = smov 0   ;;  %s1603_s0 = inlined_call_operand.vmem [shape: f32[2,8,256], index: 0, kind: input, shape index: {}]   ;;  %s1604_s1 = inlined_call_operand.vmem [shape: f32[256,128], index: 1, kind: input, shape index: {}]   ;;  %s1605_s2 = inlined_call_operand.vmem [shape: f32[1,128], index: 2, kind: input, shape index: {}]   ;;  %s1606_s3 = inlined_call_operand.vmem [shape: f32[128,128], index: 3, kind: input, shape index: {}]   ;;  %s1607_s4 = inlined_call_operand.vmem [shape: f32[1,128], index: 4, kind: input, shape index: {}]   ;;  %s1608_s5 = inlined_call_operand.vmem [shape: f32[128,128], index: 5, kind: input, shape index: {}]   ;;  %s1609_s6 = inlined_call_operand.vmem [shape: f32[1,128], index: 6, kind: input, shape index: {}]   ;;  %s1610_s7 = inlined_call_operand.vmem [shape: f32[128,128], index: 7, kind: input, shape index: {}]   ;;  %s1611_s8 = inlined_call_operand.vmem [shape: f32[1,128], index: 8, kind: input, shape index: {}]   ;;  %s1612_s9 = inlined_call_operand.vmem [shape: f32[2,2,128], index: 9, kind: output, shape index: {}]  }
   0x1   :  { %s1287_s11 = smov 0  }
   0x2 LB: > { %s31_s12 = sadd.s32 1, %s1224_s10  ;;  %p872_p0 = scmp.ge.s32.totalorder %s1228_s11, 1  ;;  %s1228_s11 = sphi %s1287_s11, %s19_s11   ;;  %s1224_s10 = sphi %s1285_s10, %s1614_s10   ;;  %s1220_s30 = sphi %s1283_s30, %s1613_s30  }
   0x3   : > { %p33_p1 = scmp.ge.s32.totalorder %s31_s12, 2  ;;  %p305_p2 = scmp.lt.s32.totalorder %s1228_s11, 3 }
   0x5   : > { %s1616_s12 = smov (%p33_p1, %s31_s12), 0  ;;  %p306_p3 = pnand %p872_p0, %p305_p2 }
   0x6   : > { %v381_v0 = vld [vmem:[%s1604_s1 + $0x80] sm:$0xff] (!%p306_p3)  ;;  %v382_v1 = vld [vmem:[%s1604_s1 + $0x88] sm:$0xff] (!%p306_p3)  ;;  %p344_p4 = scmp.lt.s32.totalorder (!%p306_p3), %s1220_s30, 1  ;;  %v383_v5 = vld [vmem:[%s1604_s1 + $0x90] sm:$0xff] (!%p306_p3)  ;;  %v1230_v7 = vmov (!%p306_p3), 0.0|0.0   ;;  %vm1232_vm0 = vmmov (!%p306_p3), 0  }
   0x7   : > { %309 = sbr.rel (%p306_p3) target bundleno = 938 (0x3aa), region = 56  ;;  %v365_v2 = vld [vmem:[%s1604_s1] sm:$0xff] (!%p306_p3)  ;;  %v1075_v3 = vpack.c.bf16 (!%p306_p3), %v382_v1, %v381_v0  ;;  %v366_v4 = vld [vmem:[%s1604_s1 + $0x8] sm:$0xff] (!%p306_p3)  ;;  %v384_v6 = vld [vmem:[%s1604_s1 + $0x98] sm:$0xff] (!%p306_p3)  ;;  %1107 = vmatprep.subr.bf16.mxu1 (!%p306_p3), %v1230_v7  ;;  %vm795_vm5 = vcmask (!%p306_p3), 1040384  }
   0x8   : > { %v1077_v8 = vpack.c.bf16 (!%p306_p3), %v366_v4, %v365_v2  ;;  %v1079_v9 = vpack.c.bf16 (!%p306_p3), %v384_v6, %v383_v5  ;;  %v367_v10 = vld [vmem:[%s1604_s1 + $0x10] sm:$0xff] (!%p306_p3)  ;;  %v368_v11 = vld [vmem:[%s1604_s1 + $0x18] sm:$0xff] (!%p306_p3)  ;;  %v385_v12 = vld [vmem:[%s1604_s1 + $0xa0] sm:$0xff] (!%p306_p3) }
   0x9   : > { %1076 = vmatprep.subr.bf16.mxu0 (!%p306_p3), %v1075_v3  ;;  %v386_v13 = vld [vmem:[%s1604_s1 + $0xa8] sm:$0xff] (!%p306_p3)  ;;  %v1081_v14 = vpack.c.bf16 (!%p306_p3), %v368_v11, %v367_v10  ;;  %v369_v16 = vld [vmem:[%s1604_s1 + $0x20] sm:$0xff] (!%p306_p3)  ;;  %v387_v18 = vld [vmem:[%s1604_s1 + $0xb0] sm:$0xff] (!%p306_p3) }
   0xa   : > { %1078 = vmatpush3.bf16.msra.mxu0 (!%p306_p3), %v1077_v8  ;;  %v1083_v15 = vpack.c.bf16 (!%p306_p3), %v386_v13, %v385_v12  ;;  %v370_v17 = vld [vmem:[%s1604_s1 + $0x28] sm:$0xff] (!%p306_p3)  ;;  %v388_v19 = vld [vmem:[%s1604_s1 + $0xb8] sm:$0xff] (!%p306_p3)  ;;  %v371_v22 = vld [vmem:[%s1604_s1 + $0x30] sm:$0xff] (!%p306_p3)  ;;  %v1231_v12 = vmov (!%p306_p3), 0.0  }
   0xb   : > { %1080 = vmatprep.subr.bf16.mxu0 (!%p306_p3), %v1079_v9  ;;  %v1085_v20 = vpack.c.bf16 (!%p306_p3), %v370_v17, %v369_v16  ;;  %v1087_v21 = vpack.c.bf16 (!%p306_p3), %v388_v19, %v387_v18  ;;  %v372_v23 = vld [vmem:[%s1604_s1 + $0x38] sm:$0xff] (!%p306_p3)  ;;  %v389_v24 = vld [vmem:[%s1604_s1 + $0xc0] sm:$0xff] (!%p306_p3)  ;;  %v390_v25 = vld [vmem:[%s1604_s1 + $0xc8] sm:$0xff] (!%p306_p3)  ;;  %361 = vst [vmem:[#allocation2] sm:$0x1] (!%p306_p3), %v1231_v12  ;;  %1002 = vmatprep.mubr.msk.f32.mxu1 (!%p306_p3), %vm1232_vm0, %v1231_v12 }
   0xc   : > { %v477_v27 = vld [vmem:[%s1606_s3] sm:$0xff] (!%p306_p3)  ;;  %v478_v28 = vld [vmem:[%s1606_s3 + $0x8] sm:$0xff] (!%p306_p3)  ;;  %v1089_v29 = vpack.c.bf16 (!%p306_p3), %v372_v23, %v371_v22  ;;  %v479_v31 = vld [vmem:[%s1606_s3 + $0x10] sm:$0xff] (!%p306_p3)  ;;  %v1091_v33 = vpack.c.bf16 (!%p306_p3), %v390_v25, %v389_v24  ;;  %362 = vst [vmem:[#allocation3] sm:$0x1] (!%p306_p3), %v1231_v12 }
   0xd   : > { %v1108_v30 = vpack.c.bf16 (!%p306_p3), %v478_v28, %v477_v27  ;;  %v480_v32 = vld [vmem:[%s1606_s3 + $0x18] sm:$0xff] (!%p306_p3)  ;;  %v373_v34 = vld [vmem:[%s1604_s1 + $0x40] sm:$0xff] (!%p306_p3)  ;;  %v374_v35 = vld [vmem:[%s1604_s1 + $0x48] sm:$0xff] (!%p306_p3) }
   0xe   : > { %s1618_s30 = smov (!%p344_p4, %s1220_s30), 1  ;;  %1082 = vmatpush3.bf16.msra.mxu0 %v1081_v14  ;;  %v391_v36 = vld [vmem:[%s1604_s1 + $0xd0] sm:$0xff]  ;;  %v392_v37 = vld [vmem:[%s1604_s1 + $0xd8] sm:$0xff]  ;;  %v1111_v38 = vpack.c.bf16 %v480_v32, %v479_v31  ;;  %v481_v39 = vld [vmem:[%s1606_s3 + $0x20] sm:$0xff]  ;;  %v1093_v41 = vpack.c.bf16 %v374_v35, %v373_v34 }
   0xf   : > { %s883_s16 = sshll.u32 %s1618_s30, 4  ;;  %1084 = vmatprep.subr.bf16.mxu0 %v1083_v15  ;;  %1109 = vmatpush3.bf16.msra.mxu1 %v1108_v30  ;;  %v482_v40 = vld [vmem:[%s1606_s3 + $0x28] sm:$0xff]  ;;  %v1095_v42 = vpack.c.bf16 %v392_v37, %v391_v36  ;;  %v375_v43 = vld [vmem:[%s1604_s1 + $0x50] sm:$0xff]  ;;  %v376_v44 = vld [vmem:[%s1604_s1 + $0x58] sm:$0xff] }
  0x10   : > { %s1350_s27 = scalar_lea.vmem %s1603_s0, %s883_s16  ;;  %1110 = vmatprep.subr.bf16.mxu1 %v1230_v7  ;;  %v393_v45 = vld [vmem:[%s1604_s1 + $0xe0] sm:$0xff]  ;;  %v394_v46 = vld [vmem:[%s1604_s1 + $0xe8] sm:$0xff]  ;;  %v1114_v47 = vpack.c.bf16 %v482_v40, %v481_v39  ;;  %v483_v48 = vld [vmem:[%s1606_s3 + $0x30] sm:$0xff]  ;;  %v1097_v50 = vpack.c.bf16 %v376_v44, %v375_v43  ;;  %s875_s16 = sshll.u32 %s1618_s30, 1 }
  0x11   : > { %v364_v26 = vld [vmem:[%s1350_s27 + $0x8] sm:$0xff]  ;;  %v484_v49 = vld [vmem:[%s1606_s3 + $0x38] sm:$0xff]  ;;  %v1099_v51 = vpack.c.bf16 %v394_v46, %v393_v45  ;;  %v377_v52 = vld [vmem:[%s1604_s1 + $0x60] sm:$0xff]  ;;  %s356_s21 = scalar_lea.vmem %s1612_s9, %s875_s16 }
  0x12   : > { %468 = vmatprep.mubr.f32.mxu0 %v364_v26  ;;  %1086 = vmatpush3.bf16.msra.mxu0 %v1085_v20  ;;  %v378_v53 = vld [vmem:[%s1604_s1 + $0x68] sm:$0xff]  ;;  %v395_v54 = vld [vmem:[%s1604_s1 + $0xf0] sm:$0xff]  ;;  %v396_v55 = vld [vmem:[%s1604_s1 + $0xf8] sm:$0xff]  ;;  %v1117_v56 = vpack.c.bf16 %v484_v49, %v483_v48 }
  0x13   : > { %1088 = vmatprep.subr.bf16.mxu0 %v1087_v21  ;;  %1112 = vmatpush3.bf16.msra.mxu1 %v1111_v38  ;;  %v485_v57 = vld [vmem:[%s1606_s3 + $0x40] sm:$0xff]  ;;  %v486_v58 = vld [vmem:[%s1606_s3 + $0x48] sm:$0xff]  ;;  %v1101_v59 = vpack.c.bf16 %v378_v53, %v377_v52  ;;  %v1103_v60 = vpack.c.bf16 %v396_v55, %v395_v54  ;;  %v379_v61 = vld [vmem:[%s1604_s1 + $0x70] sm:$0xff] }
  0x14   : > { %1113 = vmatprep.subr.bf16.mxu1 %v1230_v7  ;;  %v380_v62 = vld [vmem:[%s1604_s1 + $0x78] sm:$0xff]  ;;  %v1120_v63 = vpack.c.bf16 %v486_v58, %v485_v57  ;;  %v487_v0 = vld [vmem:[%s1606_s3 + $0x50] sm:$0xff]  ;;  %v363_v4 = vld [vmem:[%s1350_s27] sm:$0xff] }
  0x15   : > { %v488_v1 = vld [vmem:[%s1606_s3 + $0x58] sm:$0xff]  ;;  %v1105_v2 = vpack.c.bf16 %v380_v62, %v379_v61  ;;  %v489_v5 = vld [vmem:[%s1606_s3 + $0x60] sm:$0xff]  ;;  %v490_v6 = vld [vmem:[%s1606_s3 + $0x68] sm:$0xff] }
  0x16   : > { %1090 = vmatpush3.bf16.msra.mxu0 %v1089_v29  ;;  %v1123_v3 = vpack.c.bf16 %v488_v1, %v487_v0  ;;  %v1126_v8 = vpack.c.bf16 %v490_v6, %v489_v5  ;;  %v491_v9 = vld [vmem:[%s1606_s3 + $0x70] sm:$0xff]  ;;  %v492_v10 = vld [vmem:[%s1606_s3 + $0x78] sm:$0xff]  ;;  %v573_v13 = vld [vmem:[%s1608_s5] sm:$0xff] }
  0x17   : > { %1092 = vmatprep.subr.bf16.mxu0 %v1091_v33  ;;  %1115 = vmatpush3.bf16.msra.mxu1 %v1114_v47  ;;  %v1129_v11 = vpack.c.bf16 %v492_v10, %v491_v9  ;;  %v574_v14 = vld [vmem:[%s1608_s5 + $0x8] sm:$0xff]  ;;  %v575_v15 = vld [vmem:[%s1608_s5 + $0x10] sm:$0xff]  ;;  %v576_v17 = vld [vmem:[%s1608_s5 + $0x18] sm:$0xff] }
  0x18   : > { %1116 = vmatprep.subr.bf16.mxu1 %v1230_v7  ;;  %v1132_v16 = vpack.c.bf16 %v574_v14, %v573_v13  ;;  %v1135_v18 = vpack.c.bf16 %v576_v17, %v575_v15  ;;  %v577_v19 = vld [vmem:[%s1608_s5 + $0x20] sm:$0xff]  ;;  %v578_v20 = vld [vmem:[%s1608_s5 + $0x28] sm:$0xff]  ;;  %v579_v22 = vld [vmem:[%s1608_s5 + $0x30] sm:$0xff] }
  0x19   : > { %v1138_v21 = vpack.c.bf16 %v578_v20, %v577_v19  ;;  %v580_v23 = vld [vmem:[%s1608_s5 + $0x38] sm:$0xff]  ;;  %v581_v25 = vld [vmem:[%s1608_s5 + $0x40] sm:$0xff]  ;;  %v582_v26 = vld [vmem:[%s1608_s5 + $0x48] sm:$0xff] }
  0x1a   : > { %1094 = vmatpush3.bf16.msra.mxu0 %v1093_v41  ;;  %v1141_v24 = vpack.c.bf16 %v580_v23, %v579_v22  ;;  %v1144_v27 = vpack.c.bf16 %v582_v26, %v581_v25  ;;  %v583_v28 = vld [vmem:[%s1608_s5 + $0x50] sm:$0xff]  ;;  %v584_v29 = vld [vmem:[%s1608_s5 + $0x58] sm:$0xff]  ;;  %v585_v31 = vld [vmem:[%s1608_s5 + $0x60] sm:$0xff] }
  0x1b   : > { %1096 = vmatprep.subr.bf16.mxu0 %v1095_v42  ;;  %1118 = vmatpush3.bf16.msra.mxu1 %v1117_v56  ;;  %v1147_v30 = vpack.c.bf16 %v584_v29, %v583_v28  ;;  %v586_v32 = vld [vmem:[%s1608_s5 + $0x68] sm:$0xff]  ;;  %v876_v35 = vld [vmem:[%s1605_s2] ss:$0 sm:$0xff]  ;;  %v587_v41 = vld [vmem:[%s1608_s5 + $0x70] sm:$0xff] }
  0x1c   : > { %1119 = vmatprep.subr.bf16.mxu1 %v1230_v7  ;;  %v1150_v33 = vpack.c.bf16 %v586_v32, %v585_v31  ;;  %v588_v42 = vld [vmem:[%s1608_s5 + $0x78] sm:$0xff]  ;;  %v669_v44 = vld [vmem:[%s1610_s7] sm:$0xff]  ;;  %v670_v45 = vld [vmem:[%s1610_s7 + $0x8] sm:$0xff] }
  0x1d   : > { %v1153_v43 = vpack.c.bf16 %v588_v42, %v587_v41  ;;  %v671_v46 = vld [vmem:[%s1610_s7 + $0x10] sm:$0xff]  ;;  %v1156_v47 = vpack.c.bf16 %v670_v45, %v669_v44  ;;  %v672_v48 = vld [vmem:[%s1610_s7 + $0x18] sm:$0xff]  ;;  %v677_v56 = vld [vmem:[%s1610_s7 + $0x40] sm:$0xff] }
  0x1e   : > { %1098 = vmatpush3.bf16.msra.mxu0 %v1097_v50  ;;  %v1159_v49 = vpack.c.bf16 %v672_v48, %v671_v46  ;;  %v673_v50 = vld [vmem:[%s1610_s7 + $0x20] sm:$0xff]  ;;  %v675_v53 = vld [vmem:[%s1610_s7 + $0x30] sm:$0xff]  ;;  %v676_v54 = vld [vmem:[%s1610_s7 + $0x38] sm:$0xff] }
  0x1f   : > { %1100 = vmatprep.subr.bf16.mxu0 %v1099_v51  ;;  %1121 = vmatpush3.bf16.msra.mxu1 %v1120_v63  ;;  %v674_v51 = vld [vmem:[%s1610_s7 + $0x28] sm:$0xff]  ;;  %v1165_v55 = vpack.c.bf16 %v676_v54, %v675_v53  ;;  %v681_v62 = vld [vmem:[%s1610_s7 + $0x60] sm:$0xff]  ;;  %v684_v9 = vld [vmem:[%s1610_s7 + $0x78] sm:$0xff] }
  0x20   : > { %1122 = vmatprep.subr.bf16.mxu1 %v1230_v7  ;;  %v1162_v52 = vpack.c.bf16 %v674_v51, %v673_v50  ;;  %v678_v57 = vld [vmem:[%s1610_s7 + $0x48] sm:$0xff]  ;;  %v877_v1 = vld [vmem:[%s1607_s4] ss:$0 sm:$0xff] }
  0x21   : > { %v1168_v58 = vpack.c.bf16 %v678_v57, %v677_v56  ;;  %v682_v63 = vld [vmem:[%s1610_s7 + $0x68] sm:$0xff]  ;;  %v878_v10 = vld [vmem:[%s1609_s6] ss:$0 sm:$0xff] }
  0x22   : > { %1102 = vmatpush3.bf16.msra.mxu0 %v1101_v59  ;;  %v679_v59 = vld [vmem:[%s1610_s7 + $0x50] sm:$0xff]  ;;  %v1174_v0 = vpack.c.bf16 %v682_v63, %v681_v62  ;;  %v765_v32 = vld [vmem:[#allocation2] sm:$0x1] }
  0x23   : > { %1104 = vmatprep.subr.bf16.mxu0 %v1103_v60  ;;  %1124 = vmatpush3.bf16.msra.mxu1 %v1123_v3  ;;  %v680_v60 = vld [vmem:[%s1610_s7 + $0x58] sm:$0xff] }
  0x24   : > { %1125 = vmatprep.subr.bf16.mxu1 %v1230_v7  ;;  %v1171_v61 = vpack.c.bf16 %v680_v60, %v679_v59 }
  0x26   : > { %1106 = vmatpush3.bf16.msra.mxu0 %v1105_v2 }
  0x27   : > { %1131 = vmatprep.subr.bf16.mxu0 %v1230_v7  ;;  %1127 = vmatpush3.bf16.msra.mxu1 %v1126_v8  ;;  %v683_v8 = vld [vmem:[%s1610_s7 + $0x70] sm:$0xff] }
  0x28   : > { %1128 = vmatprep.subr.bf16.mxu1 %v1230_v7 }
  0x29   : > { %469 = vmatmul.mubr.f32.vlgmr.msra.gmra.mrb[0].mxu0 %v363_v4 }
  0x2a   : > { %1037 = vmatprep.mubr.msk.f32.mxu0 %vm1232_vm0, %v1231_v12  ;;  %1133 = vmatpush3.bf16.msra.mxu0 %v1132_v16  ;;  %v879_v16 = vld [vmem:[%s1611_s8] ss:$0 sm:$0xff] }
  0x2b   : > { %1130 = vmatpush3.bf16.msra.mxu1 %v1129_v11  ;;  %1134 = vmatprep.subr.bf16.mxu0 %v1230_v7 }
  0x2c   : > { %1155 = vmatprep.subr.bf16.mxu1 %v1230_v7 }
  0x2e   : > { %1136 = vmatpush3.bf16.msra.mxu0 %v1135_v18 }
  0x2f   : > { %1137 = vmatprep.subr.bf16.mxu0 %v1230_v7 }
  0x32   : > { %1139 = vmatpush3.bf16.msra.mxu0 %v1138_v21 }
  0x33   : > { %1140 = vmatprep.subr.bf16.mxu0 %v1230_v7 }
  0x36   : > { %1142 = vmatpush3.bf16.msra.mxu0 %v1141_v24 }
  0x37   : > { %1143 = vmatprep.subr.bf16.mxu0 %v1230_v7 }
  0x3a   : > { %1145 = vmatpush3.bf16.msra.mxu0 %v1144_v27 }
  0x3b   : > { %1146 = vmatprep.subr.bf16.mxu0 %v1230_v7 }
  0x3e   : > { %1148 = vmatpush3.bf16.msra.mxu0 %v1147_v30 }
  0x3f   : > { %1149 = vmatprep.subr.bf16.mxu0 %v1230_v7 }
  0x42   : > { %1151 = vmatpush3.bf16.msra.mxu0 %v1150_v33 }
  0x43   : > { %1152 = vmatprep.subr.bf16.mxu0 %v1230_v7 }
  0x46   : > { %1154 = vmatpush3.bf16.msra.mxu0 %v1153_v43 }
  0xfc   : > { %v916_v34 = vpop.f32.mrb[0].mxu0 }
  0xfd   : > { %v917_v36 = vpop.f32.mrb[1].mxu0 }
  0xfe   : > { %v918_v37 = vadd.f32 %v917_v36, %v916_v34 }
 0x100   : > { %v471_v38 = vadd.f32 %v918_v37, %v876_v35  ;;  %v774_v35 = vld [vmem:[#allocation3] sm:$0x1] }
 0x102   : > { %vm474_vm1 = vcmp.gt.f32.partialorder %v471_v38, 0.0  ;;  %v475_v39 = vmul.f32 0.01, %v471_v38 }
 0x104   : > { %v476_v40 = vsel %vm474_vm1, %v471_v38, %v475_v39 }
 0x105   : > { %1003 = vmatmul.mubr.f32.vlgmr.msra.gmra.mrb[0].mxu1 %v476_v40 }
 0x106   : > { %1072 = vmatprep.mubr.msk.f32.mxu1 %vm1232_vm0, %v1231_v12  ;;  %1157 = vmatpush3.bf16.msra.mxu1 %v1156_v47 }
 0x107   : > { %1158 = vmatprep.subr.bf16.mxu1 %v1230_v7 }
 0x10a   : > { %1160 = vmatpush3.bf16.msra.mxu1 %v1159_v49 }
 0x10b   : > { %1161 = vmatprep.subr.bf16.mxu1 %v1230_v7 }
 0x10e   : > { %1163 = vmatpush3.bf16.msra.mxu1 %v1162_v52 }
 0x10f   : > { %1164 = vmatprep.subr.bf16.mxu1 %v1230_v7 }
 0x112   : > { %1166 = vmatpush3.bf16.msra.mxu1 %v1165_v55 }
 0x113   : > { %1167 = vmatprep.subr.bf16.mxu1 %v1230_v7 }
 0x116   : > { %1169 = vmatpush3.bf16.msra.mxu1 %v1168_v58 }
 0x117   : > { %1170 = vmatprep.subr.bf16.mxu1 %v1230_v7 }
 0x11a   : > { %1172 = vmatpush3.bf16.msra.mxu1 %v1171_v61 }
 0x11b   : > { %1173 = vmatprep.subr.bf16.mxu1 %v1230_v7 }
 0x11e   : > { %1175 = vmatpush3.bf16.msra.mxu1 %v1174_v0 }
 0x11f   : > { %1176 = vmatprep.subr.bf16.mxu1 %v1230_v7  ;;  %v1177_v7 = vpack.c.bf16 %v684_v9, %v683_v8 }
 0x122   : > { %1178 = vmatpush3.bf16.msra.mxu1 %v1177_v7 }
 0x1d8   : > { %v566_v2 = vpop.f32.mrb[0].mxu1 }
 0x1d9   : > { %v567_v3 = vadd.f32 %v877_v1, %v566_v2  ;;  %v1004_v4 = vpop.f32.mrb[1].mxu1 }
 0x1db   : > { %vm570_vm2 = vcmp.gt.f32.partialorder %v567_v3, 0.0  ;;  %v571_v5 = vmul.f32 0.01, %v567_v3 }
 0x1dd   : > { %v572_v6 = vsel %vm570_vm2, %v567_v3, %v571_v5 }
 0x1de   : > { %1038 = vmatmul.mubr.f32.vlgmr.msra.gmra.mrb[2].mxu0 %v572_v6 }
 0x2b1   : > { %v662_v11 = vpop.f32.mrb[2].mxu0 }
 0x2b2   : > { %v663_v12 = vadd.f32 %v878_v10, %v662_v11  ;;  %v1039_v13 = vpop.f32.mrb[3].mxu0 }
 0x2b4   : > { %vm666_vm3 = vcmp.gt.f32.partialorder %v663_v12, 0.0  ;;  %v667_v14 = vmul.f32 0.01, %v663_v12 }
 0x2b6   : > { %v668_v15 = vsel %vm666_vm3, %v663_v12, %v667_v14 }
 0x2b7   : > { %1073 = vmatmul.mubr.f32.vlgmr.msra.gmra.mrb[2].mxu1 %v668_v15 }
 0x38a   : > { %v758_v17 = vpop.f32.mrb[2].mxu1 }
 0x38b   : > { %v759_v18 = vadd.f32 %v879_v16, %v758_v17  ;;  %v1074_v19 = vpop.f32.mrb[3].mxu1 }
 0x38d   : > { %vm762_vm4 = vcmp.gt.f32.partialorder %v759_v18, 0.0  ;;  %v763_v20 = vmul.f32 0.01, %v759_v18 }
 0x38f   : > { %v764_v21 = vsel %vm762_vm4, %v759_v18, %v763_v20 }
 0x390   : > { %v766_v22 = vrot.slane %v764_v21, 4  ;;  %v775_v23 = vand.u32 2147483647, %v764_v21 }
 0x392   : > { %v767_v24 = vadd.f32 %v766_v22, %v764_v21  ;;  %v776_v25 = vrot.slane %v775_v23, 4 }
 0x394   : > { %v768_v26 = vrot.slane %v767_v24, 2  ;;  %v777_v27 = vadd.f32 %v776_v25, %v775_v23 }
 0x396   : > { %v769_v28 = vadd.f32 %v768_v26, %v767_v24  ;;  %v778_v29 = vrot.slane %v777_v27, 2 }
 0x398   : > { %v770_v30 = vrot.slane %v769_v28, 1  ;;  %v779_v31 = vadd.f32 %v778_v29, %v777_v27 }
 0x39a   : > { %v771_v33 = vadd.f32 %v770_v30, %v769_v28  ;;  %v780_v34 = vrot.slane %v779_v31, 1 }
 0x39c   : > { %v772_v36 = vadd.f32 %v771_v33, %v765_v32  ;;  %v781_v37 = vadd.f32 %v780_v34, %v779_v31 }
 0x39e   : > { %773 = vst [vmem:[#allocation2] sm:$0x1] %v772_v36  ;;  %v782_v38 = vadd.f32 %v781_v37, %v774_v35 }
 0x3a0   : > { %783 = vst [vmem:[#allocation3] sm:$0x1] %v782_v38 }
 0x3a5   : > { %v787_v39 = vld [vmem:[#allocation2] sm:$0x1] }
 0x3a7   : > { %v880_v40 = vld [vmem:[#allocation3] ss:$0 sm:$0xff] }
 0x3a8   : > { %v796_v41 = vsel %vm795_vm5, %v787_v39, %v880_v40 }
 0x3a9   : > { %797 = vst [vmem:[%s356_s21] sm:$0x3] %v796_v41 }
 0x3aa PF: > { %s19_s11 = sadd.s32 1, %s1228_s11   ;;  %s1613_s30 = smov %s1224_s10 }
 0x3ab   : > { %p16_p5 = scmp.ge.s32.totalorder %s19_s11, 4   ;;  %s1614_s10 = smov %s1616_s12 }
 0x3ad   :  { %18 = sbr.rel (!%p16_p5) target bundleno = 2 (0x2), region = 94 }

</bundles_post_ra>
